<compile_context>
chip_gen: v5e
topology: v5e:2x2
jax: 0.10.0
libtpu: 0.0.40
codegen_flags: <defaults>
</compile_context>

<pallas_src>
import jax
import jax.numpy as jnp
from jax import lax
from jax.experimental import pallas as pl
from jax.experimental.pallas import tpu as pltpu

_MAX_TILE_N = 16384            # lane-dense tile cap (4k-16k lanes when d is small)
_TILE_VMEM_BUDGET = 24 << 20   # budget for the double-buffered per-tile working set


def _round_up(x, m):
    return ((x + m - 1) // m) * m


def _pick_item_tile(n, per_col_bytes, vmem_budget_bytes):
    """Balanced lane-dense tiling of the item axis n -> (tile_n, n_tiles)."""
    if n <= 128:
        return n, 1
    max_cols = (vmem_budget_bytes // max(per_col_bytes, 1)) // 128 * 128
    max_cols = max(128, min(_MAX_TILE_N, max_cols))
    n_tiles = pl.cdiv(n, max_cols)
    if n_tiles == 1:
        if n <= 256:
            return n, 1          # single full block: no padding, no masking needed
        n_tiles = 2              # keep >=2 tiles (v7x megacore / DMA-compute overlap)
    tile_n = _round_up(pl.cdiv(n, n_tiles), 128)
    return tile_n, pl.cdiv(n, tile_n)


def _vmem_limit(working_set_bytes):
    # Derived from the actual working set; >=16 MiB (v5e scoped default), <=48 MiB so
    # tile choices stay safe on v7x's 64 MiB physical VMEM.
    return int(min(max(working_set_bytes + (8 << 20), 16 << 20), 48 << 20))


# ---------------------------------------------------------------------------
# Affine kernel (Generator / generic u @ W + b), grid over item tiles (parallel)
# ---------------------------------------------------------------------------
def _affine_kernel(u_ref, w_ref, b_ref, o_ref):
    acc = jnp.dot(u_ref[...], w_ref[...], preferred_element_type=jnp.float32)
    o_ref[...] = (acc + b_ref[...]).astype(o_ref.dtype)


def matvec_bias(u, w, b, *, weight_dtype=None, out_dtype=jnp.float32,
                vmem_budget_bytes=_TILE_VMEM_BUDGET):
    """u @ w + b with a tiled, pipelined Pallas TPU kernel.

    u : (B, d), w : (d, n), b : (n,)  ->  (B, n) in out_dtype.
    W is never padded or copied; the ragged last tile only produces garbage in padded
    output columns which are sliced away (no cross-tile accumulation).
    """
    B, d = u.shape
    d2, n = w.shape
    assert d2 == d and b.shape == (n,)

    if weight_dtype is not None:
        w = w.astype(weight_dtype)
        u = u.astype(weight_dtype)
    w_bytes = w.dtype.itemsize
    out_bytes = jnp.dtype(out_dtype).itemsize

    b_rows = _round_up(max(B, 1), 8)                       # sublane multiple
    u_p = jnp.pad(u, ((0, b_rows - B), (0, 0)))            # tiny; W itself never copied
    b2 = b.astype(jnp.float32).reshape(1, n)

    per_col = 2 * (d * w_bytes + 4 + b_rows * out_bytes)   # W + bias + out, double buffered
    tile_n, n_tiles = _pick_item_tile(n, per_col, vmem_budget_bytes)
    n_out = tile_n * n_tiles                               # padded output *allocation* only
    working_set = per_col * tile_n + b_rows * d * w_bytes

    cost = pl.CostEstimate(
        flops=2 * b_rows * d * n,
        transcendentals=0,
        bytes_accessed=b_rows * d * w_bytes + d * n * w_bytes + n * 4 + b_rows * n * out_bytes,
    )

    out = pl.pallas_call(
        _affine_kernel,
        out_shape=jax.ShapeDtypeStruct((b_rows, n_out), out_dtype),
        grid_spec=pltpu.PrefetchScalarGridSpec(
            num_scalar_prefetch=0,
            grid=(n_tiles,),
            in_specs=[
                pl.BlockSpec((b_rows, d), lambda j: (0, 0)),
                pl.BlockSpec((d, tile_n), lambda j: (0, j)),
                pl.BlockSpec((1, tile_n), lambda j: (0, j)),
            ],
            out_specs=pl.BlockSpec((b_rows, tile_n), lambda j: (0, j)),
        ),
        compiler_params=pltpu.CompilerParams(
            dimension_semantics=("parallel",),               # independent item tiles
            vmem_limit_bytes=_vmem_limit(working_set),
        ),
        cost_estimate=cost,
    )(u_p, w, b2)
    return out[:B, :n]


def generator_forward(user_vec, item_matrix, item_bias, **kw):
    """Generator.forward: (d,) @ (d,n) + (n,) -> (n,)."""
    return matvec_bias(user_vec[None, :], item_matrix, item_bias, **kw)[0]


# ---------------------------------------------------------------------------
# Discriminator kernel: vi = attn @ W.T, contraction-tiled over the item axis
# ---------------------------------------------------------------------------
def _make_disc_kernel(n, tile_n):
    ragged = (n % tile_n) != 0

    def kernel(a_ref, w_ref, o_ref, acc_ref):
        j = pl.program_id(0)

        @pl.when(j == 0)
        def _():
            acc_ref[...] = jnp.zeros_like(acc_ref)

        a_tile = a_ref[...]
        w_tile = w_ref[...]
        if ragged:  # static: mask the stale columns of the last partial tile
            valid = (j * tile_n + lax.broadcasted_iota(jnp.int32, (1, tile_n), 1)) < n
            a_tile = jnp.where(valid, a_tile, jnp.zeros_like(a_tile))
            w_tile = jnp.where(valid, w_tile, jnp.zeros_like(w_tile))

        # acc += a_tile @ w_tile.T  (contract the item axis; no transposed copy of W)
        acc_ref[...] += lax.dot_general(
            a_tile.astype(w_tile.dtype), w_tile,
            dimension_numbers=(((1,), (1,)), ((), ())),
            preferred_element_type=jnp.float32)

        @pl.when(j == pl.num_programs(0) - 1)
        def _():
            o_ref[...] = acc_ref[...].astype(o_ref.dtype)

    return kernel


def discriminator_forward(attn, item_matrix, disc_bias, *, weight_dtype=None,
                          out_dtype=jnp.float32, vmem_budget_bytes=_TILE_VMEM_BUDGET):
    """Discriminator.forward.

    attn        : (n,)   the PyTorch module's input_tensor (attention over items)
    item_matrix : (d, n) the *untransposed* item matrix (the kernel contracts over the
                  item axis, so no W.T copy is ever materialized in HBM)
    disc_bias   : (n,)
    Returns (virtual_item (d,), virtual_item_bias (1,)) exactly like the PyTorch module:
    virtual_item = attn @ W.T ; virtual_item_bias = attn[0] * disc_bias[0].
    """
    d, n = item_matrix.shape
    assert attn.shape == (n,) and disc_bias.shape == (n,)

    w = item_matrix
    a = attn.reshape(1, n)
    if weight_dtype is not None:
        w = w.astype(weight_dtype)
        a = a.astype(weight_dtype)
    w_bytes = w.dtype.itemsize
    a_bytes = a.dtype.itemsize

    per_col = 2 * (d * w_bytes + a_bytes)
    tile_n, n_tiles = _pick_item_tile(n, per_col, vmem_budget_bytes)
    working_set = per_col * tile_n + 4 * d * 4

    cost = pl.CostEstimate(flops=2 * d * n, transcendentals=0,
                           bytes_accessed=d * n * w_bytes + n * a_bytes + d * 4)

    vi = pl.pallas_call(
        _make_disc_kernel(n, tile_n),
        out_shape=jax.ShapeDtypeStruct((1, d), out_dtype),
        grid_spec=pltpu.PrefetchScalarGridSpec(
            num_scalar_prefetch=0,
            grid=(n_tiles,),
            in_specs=[
                pl.BlockSpec((1, tile_n), lambda j: (0, j)),
                pl.BlockSpec((d, tile_n), lambda j: (0, j)),
            ],
            out_specs=pl.BlockSpec((1, d), lambda j: (0, 0)),
            scratch_shapes=[pltpu.VMEM((1, d), jnp.float32)],
        ),
        compiler_params=pltpu.CompilerParams(
            dimension_semantics=("arbitrary",),          # sequential reduction over item tiles
            vmem_limit_bytes=_vmem_limit(working_set),
        ),
        cost_estimate=cost,
    )(a, w)

    virtual_item = vi[0]
    virtual_item_bias = (attn[0].astype(jnp.float32)
                         * disc_bias[0].astype(jnp.float32))[None]
    return virtual_item, virtual_item_bias


# ---------------------------------------------------------------------------
# Fused GAN forward: generator matmul + online softmax + discriminator accumulation,
# one pass over W (flash-attention style running max / sum / rescaled accumulator)
# ---------------------------------------------------------------------------
def _make_gan_fused_kernel(n, tile_n):
    ragged = (n % tile_n) != 0

    def kernel(u_ref, w_ref, bg_ref, vi_ref, lse_ref, m_ref, l_ref, acc_ref):
        j = pl.program_id(0)

        @pl.when(j == 0)
        def _():
            m_ref[...] = jnp.full_like(m_ref, -1e30)
            l_ref[...] = jnp.zeros_like(l_ref)
            acc_ref[...] = jnp.zeros_like(acc_ref)

        w_tile = w_ref[...]
        if ragged:  # static: mask the stale columns of the last partial tile
            valid = (j * tile_n + lax.broadcasted_iota(jnp.int32, (1, tile_n), 1)) < n
            w_tile = jnp.where(valid, w_tile, jnp.zeros_like(w_tile))

        # generator logits for this item tile: (1, tile_n)
        z = jnp.dot(u_ref[...], w_tile, preferred_element_type=jnp.float32) + bg_ref[...]
        if ragged:
            z = jnp.where(valid, z, -1e30)

        # online softmax statistics
        m_new = jnp.maximum(m_ref[...], z.max(axis=-1, keepdims=True))       # (1, 1)
        alpha = jnp.exp(m_ref[...] - m_new)
        p = jnp.exp(z - m_new)                                               # (1, tile_n)
        l_ref[...] = alpha * l_ref[...] + p.sum(axis=-1, keepdims=True)
        # discriminator accumulation: acc += p @ W_tile.T (contract the item axis)
        pw = lax.dot_general(p.astype(w_tile.dtype), w_tile,
                             dimension_numbers=(((1,), (1,)), ((), ())),
                             preferred_element_type=jnp.float32)             # (1, d)
        acc_ref[...] = alpha * acc_ref[...] + pw
        m_ref[...] = m_new

        @pl.when(j == pl.num_programs(0) - 1)
        def _():
            l = l_ref[...]
            vi_ref[...] = (acc_ref[...] / l).astype(vi_ref.dtype)
            lse_ref[...] = m_ref[...] + jnp.log(l)

    return kernel


def gan_forward(user_embedding, items_embedding_matrix, items_bias_gen, items_bias_disc,
                *, weight_dtype=None, out_dtype=jnp.float32,
                vmem_budget_bytes=_TILE_VMEM_BUDGET):
    """GAN.forward: returns (virtual_item (d,), score_for_virtual_item (1,)).

    Single fused Pallas pass over item tiles (W read from HBM once)."""
    d, n = items_embedding_matrix.shape
    assert user_embedding.shape == (d,)
    assert items_bias_gen.shape == (n,) and items_bias_disc.shape == (n,)

    w = items_embedding_matrix
    u = user_embedding.reshape(1, d)
    if weight_dtype is not None:
        w = w.astype(weight_dtype)
        u = u.astype(weight_dtype)
    w_bytes = w.dtype.itemsize
    bg = items_bias_gen.astype(jnp.float32).reshape(1, n)

    per_col = 2 * (d * w_bytes + 4)
    tile_n, n_tiles = _pick_item_tile(n, per_col, vmem_budget_bytes)
    working_set = per_col * tile_n + d * w_bytes + 8 * d * 4

    cost = pl.CostEstimate(flops=4 * d * n, transcendentals=n,
                           bytes_accessed=d * n * w_bytes + n * 4 + d * 4)

    vi, lse = pl.pallas_call(
        _make_gan_fused_kernel(n, tile_n),
        out_shape=(jax.ShapeDtypeStruct((1, d), out_dtype),
                   jax.ShapeDtypeStruct((1, 1), jnp.float32)),
        grid_spec=pltpu.PrefetchScalarGridSpec(
            num_scalar_prefetch=0,
            grid=(n_tiles,),
            in_specs=[
                pl.BlockSpec((1, d), lambda j: (0, 0)),
                pl.BlockSpec((d, tile_n), lambda j: (0, j)),
                pl.BlockSpec((1, tile_n), lambda j: (0, j)),
            ],
            out_specs=[
                pl.BlockSpec((1, d), lambda j: (0, 0)),
                pl.BlockSpec((1, 1), lambda j: (0, 0)),
            ],
            scratch_shapes=[pltpu.VMEM((1, 1), jnp.float32),
                            pltpu.VMEM((1, 1), jnp.float32),
                            pltpu.VMEM((1, d), jnp.float32)],
        ),
        compiler_params=pltpu.CompilerParams(
            dimension_semantics=("arbitrary",),          # online-softmax carry across tiles
            vmem_limit_bytes=_vmem_limit(working_set),
        ),
        cost_estimate=cost,
    )(u, w, bg)

    virtual_item = vi[0]
    # a[0] = exp(z0 - logsumexp(z)); z0 is a d-length dot, recomputed in plain-jnp glue.
    z0 = (jnp.dot(u[0].astype(jnp.float32), w[:, 0].astype(jnp.float32))
          + items_bias_gen[0].astype(jnp.float32))
    a0 = jnp.exp(z0 - lse[0, 0])
    virtual_item_bias = (a0 * items_bias_disc[0].astype(jnp.float32))[None]
    score = jnp.dot(virtual_item.astype(jnp.float32),
                    user_embedding.astype(jnp.float32)) + virtual_item_bias
    return virtual_item, score


# ---------------------------------------------------------------------------
# Pure-JAX reference (mirrors the PyTorch module semantics)
# ---------------------------------------------------------------------------
def _gan_forward_ref(u, w, bg, bd):
    z = u @ w + bg
    a = jax.nn.softmax(z, axis=0)
    vi = a @ w.T
    vib = (a[0] * bd[0])[None]
    score = jnp.dot(vi, u) + vib
    return vi, score


if __name__ == "__main__":
    key = jax.random.PRNGKey(0)

    # --- Exact tiny example from the module spec: d=3 latent dims, n=2 items ---
    u_small = jnp.array([1.0, 2.0, 3.0], dtype=jnp.float32)
    w_small = jnp.array([[1.0, 2.0], [3.0, 4.0], [5.0, 6.0]], dtype=jnp.float32)
    bg_small = jnp.array([1.0, 2.0], dtype=jnp.float32)
    bd_small = jnp.array([1.0, 2.0], dtype=jnp.float32)

    gen_small = jax.block_until_ready(generator_forward(u_small, w_small, bg_small))
    assert gen_small.shape == (2,)
    assert jnp.allclose(gen_small, jnp.array([23.0, 30.0]), atol=1e-5)

    vi_s, score_s = gan_forward(u_small, w_small, bg_small, bd_small)
    vi_s = jax.block_until_ready(vi_s)
    score_s = jax.block_until_ready(score_s)
    vi_ref_s, score_ref_s = _gan_forward_ref(u_small, w_small, bg_small, bd_small)
    assert vi_s.shape == vi_ref_s.shape and score_s.shape == score_ref_s.shape
    assert jnp.allclose(vi_s, vi_ref_s, atol=1e-5, rtol=1e-5)
    assert jnp.allclose(score_s, score_ref_s, atol=1e-5, rtol=1e-5)

    # --- Small but realistic shapes: d=32 latent dims, n=2000 items ---
    # (multi-tile pipelined path, ragged last tile handled in-kernel, batched users)
    d, n, B = 32, 2000, 4
    k_u, k_w, k_bg, k_bd, k_a = jax.random.split(key, 5)
    users = jax.random.normal(k_u, (B, d), dtype=jnp.float32)
    W = jax.random.normal(k_w, (d, n), dtype=jnp.float32)
    bias_g = jax.random.normal(k_bg, (n,), dtype=jnp.float32)
    bias_d = jax.random.normal(k_bd, (n,), dtype=jnp.float32)

    # 1) batched generator / affine kernel
    ref = users @ W + bias_g
    out_f32 = jax.block_until_ready(matvec_bias(users, W, bias_g))
    assert out_f32.shape == (B, n)
    assert jnp.allclose(out_f32, ref, atol=1e-4, rtol=1e-4)

    # bf16 weight path (halves the dominant HBM stream; f32 MXU accumulation)
    out_bf16 = jax.block_until_ready(matvec_bias(users, W, bias_g, weight_dtype=jnp.bfloat16))
    assert jnp.allclose(out_bf16, ref, atol=0.5, rtol=5e-2)

    # 2) standalone discriminator (contraction-tiled, no W.T materialized)
    attn = jax.nn.softmax(jax.random.normal(k_a, (n,), dtype=jnp.float32))
    vi_d, vib_d = discriminator_forward(attn, W, bias_d)
    vi_d = jax.block_until_ready(vi_d)
    assert vi_d.shape == (d,)
    assert jnp.allclose(vi_d, attn @ W.T, atol=1e-4, rtol=1e-4)
    assert jnp.allclose(vib_d, (attn[0] * bias_d[0])[None], atol=1e-6)

    # 3) fused end-to-end GAN forward (single pass over W)
    u1 = users[0]
    vi_f, score_f = gan_forward(u1, W, bias_g, bias_d)
    vi_f = jax.block_until_ready(vi_f)
    score_f = jax.block_until_ready(score_f)
    vi_r, score_r = _gan_forward_ref(u1, W, bias_g, bias_d)
    assert vi_f.shape == (d,) and score_f.shape == (1,)
    assert jnp.allclose(vi_f, vi_r, atol=1e-4, rtol=1e-4)
    assert jnp.allclose(score_f, score_r, atol=1e-4, rtol=1e-4)

    print("KERNEL_OK")
</pallas_src>

<mosaic_0001>
module attributes {stable_mosaic.version = 11 : i64} {
  func.func @_affine_kernel(%arg0: i32, %arg1: memref<8x3xf32, #tpu.memory_space<vmem>>, %arg2: memref<3x2xf32, #tpu.memory_space<vmem>>, %arg3: memref<1x2xf32, #tpu.memory_space<vmem>>, %arg4: memref<8x2xf32, #tpu.memory_space<vmem>>) attributes {dimension_semantics = [#tpu.dimension_semantics<parallel>], iteration_bounds = array<i64: 1>, scalar_prefetch = 0 : i64, scratch_operands = 0 : i64, tpu.core_type = #tpu.core_type<tc>, window_params = [{pipeline_mode = #tpu.pipeline_mode<synchronous>, transform_indices = @transform_0, window_bounds = array<i64: 8, 3>}, {transform_indices = @transform_1, window_bounds = array<i64: 3, 2>}, {transform_indices = @transform_2, window_bounds = array<i64: 1, 2>}, {transform_indices = @transform_3, window_bounds = array<i64: 8, 2>}]} {
    %c0 = arith.constant 0 : index
    %c0_0 = arith.constant 0 : index
    %0 = vector.load %arg1[%c0, %c0_0] : memref<8x3xf32, #tpu.memory_space<vmem>>, vector<8x3xf32>
    %c0_1 = arith.constant 0 : index
    %c0_2 = arith.constant 0 : index
    %1 = vector.load %arg2[%c0_1, %c0_2] : memref<3x2xf32, #tpu.memory_space<vmem>>, vector<3x2xf32>
    %cst = arith.constant dense<0.000000e+00> : vector<8x2xf32>
    %2 = tpu.matmul %0, %1, %cst {dimension_numbers = #tpu.dot_dimension_numbers<[1], [0], [0], [1], [0, 0, 1, 1], [], []>} : vector<8x3xf32>, vector<3x2xf32>, vector<8x2xf32> -> vector<8x2xf32>
    %c0_3 = arith.constant 0 : index
    %c0_4 = arith.constant 0 : index
    %3 = vector.load %arg3[%c0_3, %c0_4] : memref<1x2xf32, #tpu.memory_space<vmem>>, vector<1x2xf32>
    %4 = vector.broadcast %3 : vector<1x2xf32> to vector<8x2xf32>
    %5 = arith.addf %2, %4 : vector<8x2xf32>
    %c0_5 = arith.constant 0 : index
    %c0_6 = arith.constant 0 : index
    %6 = vector.load %arg4[%c0_5, %c0_6] : memref<8x2xf32, #tpu.memory_space<vmem>>, vector<8x2xf32>
    tpu.vector_store %arg4[%c0_5, %c0_6], %5 {strides = array<i32>} : memref<8x2xf32, #tpu.memory_space<vmem>>, vector<8x2xf32>,
    return
  }
  func.func @transform_0(%arg0: i32) -> (i32, i32) {
    %c0_i32 = arith.constant 0 : i32
    %c0_i32_0 = arith.constant 0 : i32
    %c0_i32_1 = arith.constant 0 : i32
    return %c0_i32, %c0_i32_0 : i32, i32
  }
  func.func @transform_1(%arg0: i32) -> (i32, i32) {
    %c0_i32 = arith.constant 0 : i32
    %c0_i32_0 = arith.constant 0 : i32
    return %c0_i32, %arg0 : i32, i32
  }
  func.func @transform_2(%arg0: i32) -> (i32, i32) {
    %c0_i32 = arith.constant 0 : i32
    %c0_i32_0 = arith.constant 0 : i32
    return %c0_i32, %arg0 : i32, i32
  }
  func.func @transform_3(%arg0: i32) -> (i32, i32) {
    %c0_i32 = arith.constant 0 : i32
    %c0_i32_0 = arith.constant 0 : i32
    return %c0_i32, %arg0 : i32, i32
  }
}

</mosaic_0001>

<bundles_post_ra>
// kernel: tpu_custom_call.1
= control target key start
LH: loop header
LB: loop body
LE: loop exit
PB: predicated region body
PF: predicated region fallthrough
CT: control target
= control target key end

     0   :  { %vm24_vm0 = vcmask 1042432   ;;  %vm20_vm1 = vcmask 23552   ;;  %vm48_vm2 = vcmask 15360   ;;  %s89_s1 = inlined_call_operand.vmem [shape: f32[3,2], index: 1, kind: input, shape index: {}]   ;;  %s90_s0 = inlined_call_operand.vmem [shape: f32[8,3], index: 0, kind: input, shape index: {}]   ;;  %s91_s2 = inlined_call_operand.vmem [shape: f32[1,2], index: 2, kind: input, shape index: {}]   ;;  %s92_s3 = inlined_call_operand.vmem [shape: f32[8,2], index: 3, kind: output, shape index: {}]  }
   0x1   :  { %v15_v0 = vld [vmem:[%s89_s1] sm:$0x7] }
   0x2   :  { %v14_v1 = vld [vmem:[%s90_s0] sm:$0xff]  ;;  %54 = vmatpush.msk.msra.mxu0 %vm24_vm0, %v15_v0 }
   0x3   :  { %55 = vmatmul.msk.f32.vlgmr.msra.gmra.mxu0 %vm20_vm1, %v14_v1  ;;  %v56_v2 = vld [vmem:[%s91_s2] ss:$0 sm:$0xff] }
  0x80   :  { %v45_v3 = vpop.f32.mrf.mxu0 }
  0x81   :  { %v46_v4 = vadd.f32 %v56_v2, %v45_v3 }
  0x83   :  { %49 = vst.msk [vmem:[%s92_s3] sm:$0xff] %vm48_vm2, %v46_v4 }

</bundles_post_ra>
